<compile_context>
chip_gen: v6e
topology: v6e:2x2x1
jax: 0.10.0
libtpu: 0.0.40
codegen_flags: <defaults>
</compile_context>

<pallas_src>
import functools

import jax
import jax.numpy as jnp
from jax.experimental import pallas as pl
from jax.experimental.pallas import tpu as pltpu


def _round_up(x: int, m: int) -> int:
    return ((x + m - 1) // m) * m


def _pick_tm(M: int, cap: int = 1024) -> int:
    """Sublane-aligned M tile with minimal padding waste."""
    m8 = _round_up(M, 8)
    if m8 <= cap:
        return m8                      # single M tile, zero waste beyond x8
    best, best_pad = cap, _round_up(M, cap) - M
    for cand in (cap, (3 * cap) // 4, cap // 2, (3 * cap) // 8, cap // 4):
        cand = max(_round_up(cand, 8), 8)
        pad = _round_up(M, cand) - M
        if pad < best_pad:
            best, best_pad = cand, pad
    return best


def _largest_lane_tile(dim_padded: int, cap: int) -> int:
    """Largest multiple of 128 <= cap that divides dim_padded (a x128 multiple)."""
    t = min(cap, dim_padded)
    t = (t // 128) * 128
    while t > 128:
        if dim_padded % t == 0:
            return t
        t -= 128
    return 128


def _fc_kernel(x_ref, w_ref, b_ref, o_ref, acc_ref, *, apply_relu: bool):
    # x_ref: (tm, tk)  w_ref: (tk, tn)  b_ref: (1, tn) f32
    # o_ref: (tm, tn)  acc_ref: (tm, tn) f32, resident across the k axis.
    k = pl.program_id(2)

    @pl.when(k == 0)
    def _():
        acc_ref[...] = jnp.zeros_like(acc_ref)

    # Operands already arrive in compute dtype (bf16/f32) -> straight to MXU.
    acc_ref[...] += jnp.dot(
        x_ref[...], w_ref[...], preferred_element_type=jnp.float32
    )

    @pl.when(k == pl.num_programs(2) - 1)
    def _():
        out = acc_ref[...] + b_ref[...]          # (1, tn) broadcast over rows
        if apply_relu:
            out = jnp.maximum(out, 0.0)
        o_ref[...] = out.astype(o_ref.dtype)


def prepare_params(weight_nk, bias, compute_dtype=jnp.bfloat16):
    """One-time (per-init) param prep: transpose PyTorch [N, K] weight to
    [K, N], pad to lane multiples of 128, and cast to the MXU compute dtype.
    Bias stays f32 (added to the f32 accumulator)."""
    N, K = weight_nk.shape
    Kp, Np = _round_up(K, 128), _round_up(N, 128)
    w_kn = jnp.pad(weight_nk.T, ((0, Kp - K), (0, Np - N))).astype(compute_dtype)
    b_row = jnp.pad(bias.astype(jnp.float32), (0, Np - N)).reshape(1, Np)
    return w_kn, b_row


def fully_connected(x, w_kn, bias_row, out_dim, *, apply_relu=False,
                    out_dtype=None, tm_cap=1024, tn_cap=1024):
    """y[:, :out_dim] = x @ W.T + b (+ReLU), with W prepared by prepare_params.

    x:        (M, K)  any float dtype
    w_kn:     (Kp, Np) compute-dtype weight (pre-transposed + padded)
    bias_row: (1, Np) f32
    """
    M, K = x.shape
    Kp, Np = w_kn.shape
    assert bias_row.shape == (1, Np) and K <= Kp and out_dim <= Np

    compute_dtype = w_kn.dtype
    in_b = jnp.dtype(compute_dtype).itemsize
    out_dtype = x.dtype if out_dtype is None else out_dtype
    out_b = jnp.dtype(out_dtype).itemsize

    # ---- Tile selection (lane-dense N/K, sublane-dense M) ----------------
    tm = _pick_tm(M, tm_cap)
    tn = _largest_lane_tile(Np, tn_cap)
    tk_cap = 1024 if in_b <= 2 else 512
    tk = _largest_lane_tile(Kp, tk_cap)
    Mp = _round_up(M, tm)

    # x is the only per-call pad (K alignment + residual M rows); weight and
    # bias were padded once at init, and tn/tk divide Np/Kp exactly.
    xp = x.astype(compute_dtype)
    if Mp != M or Kp != K:
        xp = jnp.pad(xp, ((0, Mp - M), (0, Kp - K)))

    grid = (Mp // tm, Np // tn, Kp // tk)

    # ---- Explicit VMEM budget: actual working set + headroom, <=48 MiB ----
    vmem_bytes = (2 * (tm * tk + tk * tn) * in_b     # double-buffered x / W
                  + 2 * tn * 4                        # double-buffered bias
                  + 2 * tm * tn * out_b               # double-buffered output
                  + tm * tn * 4)                      # f32 accumulator scratch
    vmem_limit = int(min(max(vmem_bytes + (8 << 20), 32 << 20), 48 << 20))

    kernel = functools.partial(_fc_kernel, apply_relu=apply_relu)

    out_p = pl.pallas_call(
        kernel,
        out_shape=jax.ShapeDtypeStruct((Mp, Np), out_dtype),
        grid_spec=pltpu.PrefetchScalarGridSpec(
            num_scalar_prefetch=0,
            grid=grid,
            in_specs=[
                pl.BlockSpec((tm, tk), lambda i, j, k: (i, k)),   # x tile
                pl.BlockSpec((tk, tn), lambda i, j, k: (k, j)),   # W [K,N] tile
                pl.BlockSpec((1, tn), lambda i, j, k: (0, j)),    # bias tile
            ],
            out_specs=pl.BlockSpec((tm, tn), lambda i, j, k: (i, j)),
            scratch_shapes=[pltpu.VMEM((tm, tn), jnp.float32)],
        ),
        compiler_params=pltpu.CompilerParams(
            dimension_semantics=("parallel", "parallel", "arbitrary"),
            vmem_limit_bytes=vmem_limit,
        ),
        cost_estimate=pl.CostEstimate(
            flops=2 * Mp * Np * Kp,
            transcendentals=0,
            bytes_accessed=int(grid[1] * Mp * Kp * in_b      # x re-streamed per j
                               + grid[0] * Np * Kp * in_b    # W re-streamed per i
                               + Np * 4                      # bias
                               + Mp * Np * out_b),           # output writeback
        ),
    )(xp, w_kn, bias_row)

    if Mp == M and Np == out_dim:
        return out_p
    return out_p[:M, :out_dim]


def init_fully_connected_params(key, input_dim, output_dim, bias_const=0.0):
    """Matches the PyTorch module's __init__: xavier_uniform_ weight
    (shape [out, in]), constant bias."""
    bound = (6.0 / (input_dim + output_dim)) ** 0.5
    weight = jax.random.uniform(
        key, (output_dim, input_dim), dtype=jnp.float32,
        minval=-bound, maxval=bound,
    )
    bias = jnp.full((output_dim,), bias_const, dtype=jnp.float32)
    return weight, bias


if __name__ == "__main__":
    key = jax.random.PRNGKey(0)
    k_x, k_w = jax.random.split(key)

    batch, input_dim, output_dim = 8, 32, 64
    x = jax.random.normal(k_x, (batch, input_dim), dtype=jnp.float32)
    weight, bias = init_fully_connected_params(
        k_w, input_dim, output_dim, bias_const=0.1
    )

    # Reference (module with nonlinearity_cls=nn.ReLU).
    y_ref = jnp.maximum(x @ weight.T + bias, 0.0)

    # 1) Exact f32 path.
    w_f32, b_row = prepare_params(weight, bias, compute_dtype=jnp.float32)
    y_f32 = fully_connected(x, w_f32, b_row, output_dim, apply_relu=True)
    y_f32 = jax.block_until_ready(y_f32)
    assert y_f32.shape == (batch, output_dim)
    assert jnp.allclose(y_f32, y_ref, atol=1e-4, rtol=1e-4)

    # 2) Default bf16-operand MXU path (f32 accumulation) -- looser tolerance.
    w_bf16, b_row16 = prepare_params(weight, bias, compute_dtype=jnp.bfloat16)
    y_bf16 = fully_connected(x, w_bf16, b_row16, output_dim, apply_relu=True)
    y_bf16 = jax.block_until_ready(y_bf16)
    assert y_bf16.shape == (batch, output_dim)
    assert jnp.allclose(y_bf16, y_ref, atol=5e-2, rtol=5e-2)

    # 3) No-nonlinearity path (nonlinearity_cls=None).
    y_lin = fully_connected(x, w_f32, b_row, output_dim, apply_relu=False)
    y_lin = jax.block_until_ready(y_lin)
    assert jnp.allclose(y_lin, x @ weight.T + bias, atol=1e-4, rtol=1e-4)

    print("KERNEL_OK")
</pallas_src>

<mosaic_0001>
module attributes {stable_mosaic.version = 11 : i64} {
  func.func @_fc_kernel(%arg0: i32, %arg1: i32, %arg2: i32, %arg3: memref<8x128xf32, #tpu.memory_space<vmem>>, %arg4: memref<128x128xf32, #tpu.memory_space<vmem>>, %arg5: memref<1x128xf32, #tpu.memory_space<vmem>>, %arg6: memref<8x128xf32, #tpu.memory_space<vmem>>, %arg7: memref<8x128xf32, #tpu.memory_space<vmem>>) attributes {dimension_semantics = [#tpu.dimension_semantics<parallel>, #tpu.dimension_semantics<parallel>, #tpu.dimension_semantics<arbitrary>], iteration_bounds = array<i64: 1, 1, 1>, scalar_prefetch = 0 : i64, scratch_operands = 1 : i64, tpu.core_type = #tpu.core_type<tc>, window_params = [{transform_indices = @transform_0, window_bounds = array<i64: 8, 128>}, {transform_indices = @transform_1, window_bounds = array<i64: 128, 128>}, {transform_indices = @transform_2, window_bounds = array<i64: 1, 128>}, {transform_indices = @transform_3, window_bounds = array<i64: 8, 128>}]} {
    %c0_i32 = arith.constant 0 : i32
    %0 = arith.cmpi eq, %arg2, %c0_i32 : i32
    %1 = arith.extui %0 : i1 to i32
    %c0_i32_0 = arith.constant 0 : i32
    %2 = arith.cmpi ne, %1, %c0_i32_0 : i32
    scf.if %2 {
      %cst_10 = arith.constant 0.000000e+00 : f32
      %12 = vector.broadcast %cst_10 : f32 to vector<8x128xf32>
      %c0_11 = arith.constant 0 : index
      %c0_12 = arith.constant 0 : index
      %13 = vector.load %arg7[%c0_11, %c0_12] : memref<8x128xf32, #tpu.memory_space<vmem>>, vector<8x128xf32>
      tpu.vector_store %arg7[%c0_11, %c0_12], %12 {strides = array<i32>} : memref<8x128xf32, #tpu.memory_space<vmem>>, vector<8x128xf32>,
    } else {
    }
    %c0 = arith.constant 0 : index
    %c0_1 = arith.constant 0 : index
    %3 = vector.load %arg7[%c0, %c0_1] : memref<8x128xf32, #tpu.memory_space<vmem>>, vector<8x128xf32>
    %c0_2 = arith.constant 0 : index
    %c0_3 = arith.constant 0 : index
    %4 = vector.load %arg3[%c0_2, %c0_3] : memref<8x128xf32, #tpu.memory_space<vmem>>, vector<8x128xf32>
    %c0_4 = arith.constant 0 : index
    %c0_5 = arith.constant 0 : index
    %5 = vector.load %arg4[%c0_4, %c0_5] : memref<128x128xf32, #tpu.memory_space<vmem>>, vector<128x128xf32>
    %cst = arith.constant dense<0.000000e+00> : vector<8x128xf32>
    %6 = tpu.matmul %4, %5, %cst {dimension_numbers = #tpu.dot_dimension_numbers<[1], [0], [0], [1], [0, 0, 1, 1], [], []>} : vector<8x128xf32>, vector<128x128xf32>, vector<8x128xf32> -> vector<8x128xf32>
    %7 = arith.addf %3, %6 : vector<8x128xf32>
    %c0_6 = arith.constant 0 : index
    %c0_7 = arith.constant 0 : index
    %8 = vector.load %arg7[%c0_6, %c0_7] : memref<8x128xf32, #tpu.memory_space<vmem>>, vector<8x128xf32>
    tpu.vector_store %arg7[%c0_6, %c0_7], %7 {strides = array<i32>} : memref<8x128xf32, #tpu.memory_space<vmem>>, vector<8x128xf32>,
    %c0_i32_8 = arith.constant 0 : i32
    %9 = arith.cmpi eq, %arg2, %c0_i32_8 : i32
    %10 = arith.extui %9 : i1 to i32
    %c0_i32_9 = arith.constant 0 : i32
    %11 = arith.cmpi ne, %10, %c0_i32_9 : i32
    scf.if %11 {
      %c0_10 = arith.constant 0 : index
      %c0_11 = arith.constant 0 : index
      %12 = vector.load %arg7[%c0_10, %c0_11] : memref<8x128xf32, #tpu.memory_space<vmem>>, vector<8x128xf32>
      %c0_12 = arith.constant 0 : index
      %c0_13 = arith.constant 0 : index
      %13 = vector.load %arg5[%c0_12, %c0_13] : memref<1x128xf32, #tpu.memory_space<vmem>>, vector<1x128xf32>
      %14 = vector.broadcast %13 : vector<1x128xf32> to vector<8x128xf32>
      %15 = arith.addf %12, %14 : vector<8x128xf32>
      %cst_14 = arith.constant 0.000000e+00 : f32
      %16 = vector.broadcast %cst_14 : f32 to vector<8x128xf32>
      %17 = arith.maximumf %15, %16 : vector<8x128xf32>
      %c0_15 = arith.constant 0 : index
      %c0_16 = arith.constant 0 : index
      %18 = vector.load %arg6[%c0_15, %c0_16] : memref<8x128xf32, #tpu.memory_space<vmem>>, vector<8x128xf32>
      tpu.vector_store %arg6[%c0_15, %c0_16], %17 {strides = array<i32>} : memref<8x128xf32, #tpu.memory_space<vmem>>, vector<8x128xf32>,
    } else {
    }
    return
  }
  func.func @transform_0(%arg0: i32, %arg1: i32, %arg2: i32) -> (i32, i32) {
    %c0_i32 = arith.constant 0 : i32
    return %arg0, %arg2 : i32, i32
  }
  func.func @transform_1(%arg0: i32, %arg1: i32, %arg2: i32) -> (i32, i32) {
    %c0_i32 = arith.constant 0 : i32
    return %arg2, %arg1 : i32, i32
  }
  func.func @transform_2(%arg0: i32, %arg1: i32, %arg2: i32) -> (i32, i32) {
    %c0_i32 = arith.constant 0 : i32
    %c0_i32_0 = arith.constant 0 : i32
    return %c0_i32, %arg1 : i32, i32
  }
  func.func @transform_3(%arg0: i32, %arg1: i32, %arg2: i32) -> (i32, i32) {
    %c0_i32 = arith.constant 0 : i32
    return %arg0, %arg1 : i32, i32
  }
}

</mosaic_0001>

<bundles_post_ra>
// kernel: tpu_custom_call.1
= control target key start
LH: loop header
LB: loop body
LE: loop exit
PB: predicated region body
PF: predicated region fallthrough
CT: control target
= control target key end

     0   :  { %8 = vsyncpa [#allocation4], 0  ;;  %s331_s0 = inlined_call_operand.hbm [shape: f32[8,128], index: 0, kind: input, shape index: {}]   ;;  %s332_s1 = inlined_call_operand.hbm [shape: f32[128,128], index: 1, kind: input, shape index: {}]   ;;  %s333_s2 = inlined_call_operand.vmem [shape: f32[1,128], index: 2, kind: input, shape index: {}]   ;;  %s334_s3 = inlined_call_operand.hbm [shape: f32[8,128], index: 3, kind: output, shape index: {}]  }
   0x1   :  { %9 = vsyncpa [#allocation7], 0 }
   0x2   :  { %10 = vsyncpa [#allocation5], 0  ;;  %s292_s12 = smov [#allocation3]   ;;  %s293_s14 = smov [#allocation6]  }
   0x3   :  { %s17_s13 = sshll.u32 %s292_s12, 4  ;;  %s26_s15 = sshll.u32 %s293_s14, 4  ;;  %s18_s13 = int_to_ptr.vmem [resolvable:$true] %s17_s13  ;;  %s27_s15 = int_to_ptr.vmem [resolvable:$true] %s26_s15 }
   0x4   :  { %s234_s16 = scalar_lea.vmem %s18_s13, 128  ;;  %p239_p1 = scmp.lt.s32.totalorder %s18_s13, %s18_s13 }
   0x5   :  { %p235_p0 = scmp.ne.s32.totalorder %s18_s13, %s234_s16  ;;  %p240_p2 = scmp.lt.s32.totalorder %s234_s16, %s234_s16 }
   0x7   :  { %p241_p3 = por %p240_p2, %p239_p1 }
   0x9   :  { %p242_p4 = pnand %p241_p3, %p235_p0 }
   0xb   :  { %245 = shalt.err (!%p242_p4)
}
   0xc   :  { %20 = dma.hbm_to_vmem [thread:$0]  %s331_s0, 128, %s18_s13, [#allocation4]  }
   0xd   :  { %s254_s19 = scalar_lea.vmem %s27_s15, 2048  ;;  %p259_p6 = scmp.lt.s32.totalorder %s27_s15, %s27_s15 }
   0xe   :  { %p255_p5 = scmp.ne.s32.totalorder %s27_s15, %s254_s19  ;;  %p260_p7 = scmp.lt.s32.totalorder %s254_s19, %s254_s19 }
  0x10   :  { %p261_p8 = por %p260_p7, %p259_p6 }
  0x12   :  { %p262_p9 = pnand %p261_p8, %p255_p5 }
  0x14   :  { %265 = shalt.err (!%p262_p9)
}
  0x15   :  { %s294_s20 = smov 128   ;;  %s295_s21 = smov 8  }
  0x16   :  { %32 = dma.hbm_to_vmem [thread:$0]  %s332_s1, 2048, %s27_s15, [#allocation7], %s294_s20, %s294_s20, %s295_s21  }
  0x17   :  { %286 = dma.done.wait [#allocation4], 128  }
  0x18   :  { %287 = vsyncadd [#allocation4], 4294967168 }
  0x19   :  { %288 = dma.done.wait [#allocation7], 2048  }
  0x1a   :  { %289 = vsyncadd [#allocation7], 4294965248  ;;  %v296_v0 = vmov 0.0   ;;  %vm297_vm0 = vmmov 0   ;;  %v63_v1 = vld [vmem:[#allocation6 + $0x78] sm:$0xff]  ;;  %v62_v2 = vld [vmem:[#allocation6 + $0x70] sm:$0xff] }
  0x1b   :  { %184 = vmatprep.subr.mxu0 %v296_v0  ;;  %216 = vmatprep.mubr.msk.f32.mxu0 %vm297_vm0, %v296_v0  ;;  %v61_v3 = vld [vmem:[#allocation6 + $0x68] sm:$0xff]  ;;  %v60_v4 = vld [vmem:[#allocation6 + $0x60] sm:$0xff]  ;;  %v59_v5 = vld [vmem:[#allocation6 + $0x58] sm:$0xff]  ;;  %s298_s24 = smov [#allocation8]  }
  0x1c   :  { %185 = vmatpush3.msra.mxu0 %v63_v1  ;;  %v58_v6 = vld [vmem:[#allocation6 + $0x50] sm:$0xff]  ;;  %v57_v7 = vld [vmem:[#allocation6 + $0x48] sm:$0xff]  ;;  %v56_v8 = vld [vmem:[#allocation6 + $0x40] sm:$0xff]  ;;  %s156_s25 = sshll.u32 %s298_s24, 4  ;;  %s157_s25 = int_to_ptr.vmem [resolvable:$true] %s156_s25 }
  0x1d   :  { %186 = vmatprep.subr.mxu0 %v296_v0  ;;  %v55_v9 = vld [vmem:[#allocation6 + $0x38] sm:$0xff]  ;;  %v54_v10 = vld [vmem:[#allocation6 + $0x30] sm:$0xff]  ;;  %v53_v11 = vld [vmem:[#allocation6 + $0x28] sm:$0xff]  ;;  %s266_s26 = scalar_lea.vmem %s157_s25, 128  ;;  %p271_p11 = scmp.lt.s32.totalorder %s157_s25, %s157_s25 }
  0x1e   :  { %187 = vmatpush3.msra.mxu0 %v62_v2  ;;  %v52_v12 = vld [vmem:[#allocation6 + $0x20] sm:$0xff]  ;;  %v51_v13 = vld [vmem:[#allocation6 + $0x18] sm:$0xff]  ;;  %v50_v14 = vld [vmem:[#allocation6 + $0x10] sm:$0xff]  ;;  %p267_p10 = scmp.ne.s32.totalorder %s157_s25, %s266_s26  ;;  %p272_p12 = scmp.lt.s32.totalorder %s266_s26, %s266_s26 }
  0x1f   :  { %188 = vmatprep.subr.mxu0 %v296_v0  ;;  %v49_v15 = vld [vmem:[#allocation6 + $0x8] sm:$0xff]  ;;  %v48_v16 = vld [vmem:[#allocation6] sm:$0xff]  ;;  %v47_v17 = vld [vmem:[#allocation3] sm:$0xff] }
  0x20   :  { %189 = vmatpush3.msra.mxu0 %v61_v3  ;;  %v166_v18 = vld [vmem:[%s333_s2] ss:$0 sm:$0xff]  ;;  %p273_p13 = por %p272_p12, %p271_p11 }
  0x21   :  { %190 = vmatprep.subr.mxu0 %v296_v0 }
  0x22   :  { %191 = vmatpush3.msra.mxu0 %v60_v4  ;;  %p274_p0 = pnand %p273_p13, %p267_p10 }
  0x23   :  { %192 = vmatprep.subr.mxu0 %v296_v0 }
  0x24   :  { %193 = vmatpush3.msra.mxu0 %v59_v5 }
  0x25   :  { %194 = vmatprep.subr.mxu0 %v296_v0 }
  0x26   :  { %195 = vmatpush3.msra.mxu0 %v58_v6 }
  0x27   :  { %196 = vmatprep.subr.mxu0 %v296_v0 }
  0x28   :  { %197 = vmatpush3.msra.mxu0 %v57_v7 }
  0x29   :  { %198 = vmatprep.subr.mxu0 %v296_v0 }
  0x2a   :  { %199 = vmatpush3.msra.mxu0 %v56_v8 }
  0x2b   :  { %200 = vmatprep.subr.mxu0 %v296_v0 }
  0x2c   :  { %201 = vmatpush3.msra.mxu0 %v55_v9 }
  0x2d   :  { %202 = vmatprep.subr.mxu0 %v296_v0 }
  0x2e   :  { %203 = vmatpush3.msra.mxu0 %v54_v10 }
  0x2f   :  { %204 = vmatprep.subr.mxu0 %v296_v0 }
  0x30   :  { %205 = vmatpush3.msra.mxu0 %v53_v11 }
  0x31   :  { %206 = vmatprep.subr.mxu0 %v296_v0 }
  0x32   :  { %207 = vmatpush3.msra.mxu0 %v52_v12 }
  0x33   :  { %208 = vmatprep.subr.mxu0 %v296_v0 }
  0x34   :  { %209 = vmatpush3.msra.mxu0 %v51_v13 }
  0x35   :  { %210 = vmatprep.subr.mxu0 %v296_v0 }
  0x36   :  { %211 = vmatpush3.msra.mxu0 %v50_v14 }
  0x37   :  { %212 = vmatprep.subr.mxu0 %v296_v0 }
  0x38   :  { %213 = vmatpush3.msra.mxu0 %v49_v15 }
  0x39   :  { %214 = vmatprep.subr.mxu0 %v296_v0 }
  0x3a   :  { %215 = vmatpush3.msra.mxu0 %v48_v16 }
  0x3b   :  { %217 = vmatmul.mubr.f32.vlgmr.msra.gmra.mxu0 %v47_v17 }
  0xfb   :  { %v130_v19 = vpop.f32.mrf.mxu0 }
  0xfc   :  { %v147_v20 = vadd.f32 %v166_v18, %v130_v19 }
  0xfd   :  { %v218_v21 = vpop.f32.mrf.mxu0 }
  0xfe   :  { %v148_v22 = vmax.f32 %v147_v20, 0.0 }
 0x100   :  { %149 = vst [vmem:[#allocation8] sm:$0xff] %v148_v22 }
 0x101   :  { %277 = shalt.err (!%p274_p0)
}
 0x102   :  { %159 = dma.vmem_to_hbm [thread:$0]  %s157_s25, 128, %s334_s3, [#allocation5]  }
 0x103   :  { %290 = dma.done.wait [#allocation5], 128  }
 0x104   :  { %291 = vsyncadd [#allocation5], 4294967168 }
 0x105   :  { %163 = vsyncpa [#allocation4], 1 }
 0x106   :  { %164 = vsyncpa [#allocation7], 1 }
 0x107   :  { %165 = vsyncpa [#allocation5], 1 }

</bundles_post_ra>
